<compile_context>
chip_gen: v6e
topology: v6e:2x2x1
jax: 0.10.0
libtpu: 0.0.40
codegen_flags: <defaults>
</compile_context>

<pallas_src>
import functools

import jax
import jax.numpy as jnp
from jax.experimental import pallas as pl
from jax.experimental.pallas import tpu as pltpu

TEMPERATURE = 0.1
EPS = 1e-12  # matches torch.nn.functional.normalize default eps


def _infonce_kernel(q_ref, kt_ref, pos_ref, loss_ref, l_sc, *, inv_temp):
    """One (block_q, block_k) logits tile of the InfoNCE forward pass.

    grid = (num_q_tiles, num_k_tiles); the key axis is an "arbitrary"
    reduction with the running sum-exp held in VMEM scratch.
      q_ref  : (block_q, D)  pre-normalized queries, 1/temperature folded in
      kt_ref : (D, block_k)  pre-normalized keys, pre-transposed in HBM
      pos_ref: (block_q, 1)  positive (diagonal) logit, f32
    """
    ki = pl.program_id(1)
    nk = pl.num_programs(1)

    @pl.when(ki == 0)
    def _init():
        l_sc[...] = jnp.zeros_like(l_sc)

    # Scaled logits tile: (q/||q||/temp) @ (k/||k||)^T.  The MXU consumes the
    # pre-transposed key tile directly (standard A @ B contraction, no
    # in-kernel relayout), accumulating in f32.
    s = jax.lax.dot_general(
        q_ref[...], kt_ref[...],
        dimension_numbers=(((1,), (0,)), ((), ())),
        preferred_element_type=jnp.float32)

    # Bounded-logits logsumexp: operands are L2-normalized, so s <= 1/temp.
    # Use that constant as the max -- no online running max / rescale needed.
    l_sc[...] += jnp.sum(jnp.exp(s - inv_temp), axis=-1, keepdims=True)

    @pl.when(ki == nk - 1)
    def _finalize():
        lse = inv_temp + jnp.log(l_sc[...])
        loss_ref[...] = lse - pos_ref[...]  # per-row cross-entropy loss


def _vmem_capacity_bytes():
    try:
        return int(pltpu.get_tpu_info().vmem_capacity_bytes)
    except Exception:
        return 64 * 1024 * 1024  # conservative (v7x per-core VMEM)


def _pick_block(n, preferred, steps):
    """Largest multiple of one of `steps` that divides n and is <= preferred.

    Prefers coarse (MXU-friendly, 256/128) step sizes before falling back to
    finer ones; returns n (full, un-tiled dim) when nothing divides."""
    for step in steps:
        if n >= step and n % step == 0:
            b = min(preferred, n)
            b -= b % step
            while b >= step:
                if n % b == 0:
                    return b
                b -= step
    return n


def _vmem_estimate_bytes(block_q, block_k, d, mm_bytes):
    # Double-buffered input/output tiles + scratch + f32 logits intermediates.
    dbuf = 2
    tiles = dbuf * (block_q * d * mm_bytes      # query tile
                    + d * block_k * mm_bytes    # key^T tile
                    + block_q * 4               # positive-logit tile
                    + block_q * 4)              # per-row loss tile
    scratch = block_q * 4                       # running sum-exp
    logits = 2 * block_q * block_k * 4          # s + exp(s)
    return tiles + scratch + logits


def _l2_normalize(x):
    # F.normalize(dim=-1): x / max(||x||, eps), fused into a single rsqrt.
    x = x.astype(jnp.float32)
    sq = jnp.sum(x * x, axis=-1, keepdims=True)
    return x * jax.lax.rsqrt(jnp.maximum(sq, EPS * EPS))


def info_nce_pallas(query, positive_key, *, temperature=TEMPERATURE,
                    reduction="mean", block_q=None, block_k=None,
                    matmul_dtype=jnp.bfloat16, vmem_limit_bytes=None):
    """InfoNCE forward pass (negative_keys=None path of the PyTorch module)."""
    assert query.ndim == 2 and positive_key.ndim == 2
    assert query.shape == positive_key.shape
    n, d = query.shape
    inv_temp = float(1.0 / temperature)
    mm_bytes = jnp.dtype(matmul_dtype).itemsize

    # --- one-time O(N*D) preprocessing, hoisted out of the O(N^2) kernel ----
    qn = _l2_normalize(query)
    kn = _l2_normalize(positive_key)
    q_mm = (qn * inv_temp).astype(matmul_dtype)   # 1/temperature folded in
    k_mm = kn.astype(matmul_dtype)
    kt_mm = k_mm.T                                # (D, N): lane-dense MXU tile
    # Positive (diagonal) logit (labels == arange(N)) from the same
    # reduced-precision operands the matmul sees, accumulated in f32.
    pos = jnp.sum(q_mm.astype(jnp.float32) * k_mm.astype(jnp.float32),
                  axis=-1, keepdims=True)

    # --- generation-aware tile selection ------------------------------------
    auto_q = block_q is None
    if auto_q:
        block_q = _pick_block(n, 256, (256, 128, 8))
    if block_k is None:
        block_k = _pick_block(n, 512, (256, 128))  # lane axis: 128-multiples
    # Shrink against the VMEM budget (v7x has half the VMEM of v5e/v6e).
    budget = max(_vmem_capacity_bytes() // 3, 8 * 1024 * 1024)
    while _vmem_estimate_bytes(block_q, block_k, d, mm_bytes) > budget:
        if block_k >= 256 and (block_k // 2) % 128 == 0:
            block_k //= 2
        elif block_q >= 16 and (block_q // 2) % 8 == 0:
            block_q //= 2
        else:
            break
    # Keep nq >= 2 when possible so the "parallel" axis can shard across the
    # two v7x TensorCores (harmless on single-TC v5e/v6e).
    if auto_q and block_q == n and n % 16 == 0:
        block_q = n // 2

    assert n % block_q == 0 and (block_q % 8 == 0 or block_q == n)
    assert n % block_k == 0 and (block_k % 128 == 0 or block_k == n)
    nq, nk = n // block_q, n // block_k

    if vmem_limit_bytes is None:
        est = _vmem_estimate_bytes(block_q, block_k, d, mm_bytes)
        vmem_limit_bytes = int(min(max(2 * est, 32 * 1024 * 1024),
                                   _vmem_capacity_bytes()))

    kernel = functools.partial(_infonce_kernel, inv_temp=inv_temp)

    per_row = pl.pallas_call(
        kernel,
        out_shape=jax.ShapeDtypeStruct((n, 1), jnp.float32),
        grid_spec=pltpu.PrefetchScalarGridSpec(
            num_scalar_prefetch=0,
            grid=(nq, nk),
            in_specs=[
                pl.BlockSpec((block_q, d), lambda qi, ki: (qi, 0)),  # queries
                pl.BlockSpec((d, block_k), lambda qi, ki: (0, ki)),  # keys^T
                pl.BlockSpec((block_q, 1), lambda qi, ki: (qi, 0)),  # pos logit
            ],
            out_specs=pl.BlockSpec((block_q, 1), lambda qi, ki: (qi, 0)),
            scratch_shapes=[
                pltpu.VMEM((block_q, 1), jnp.float32),  # running sum-exp
            ]),
        compiler_params=pltpu.CompilerParams(
            dimension_semantics=("parallel", "arbitrary"),
            vmem_limit_bytes=vmem_limit_bytes),
    )(q_mm, kt_mm, pos)

    # TODO(synk): negative_keys ('unpaired'/'paired'), mask and margin branches
    # of info_nce are not exercised by the default module config and are not
    # implemented in the kernel.
    if reduction == "none":
        return per_row[:, 0]
    total = jnp.sum(per_row)
    if reduction == "sum":
        return total
    return total * (1.0 / n)  # 'mean' via constant reciprocal


def _info_nce_ref(query, positive_key, temperature=TEMPERATURE):
    # Pure-JAX reference mirroring the PyTorch negative_keys=None path.
    def norm(x):
        return x / jnp.maximum(jnp.linalg.norm(x, axis=-1, keepdims=True), EPS)

    q, k = norm(query), norm(positive_key)
    logits = (q @ k.T) / temperature
    logp = jax.nn.log_softmax(logits, axis=-1)
    return -jnp.mean(jnp.diag(logp))


if __name__ == "__main__":
    key = jax.random.PRNGKey(0)
    kq, kp = jax.random.split(key)

    # Module docstring shapes: batch_size=32, embedding_size=128.
    N, D = 32, 128
    query = jax.random.normal(kq, (N, D), dtype=jnp.float32)
    positive_key = jax.random.normal(kp, (N, D), dtype=jnp.float32)
    ref = _info_nce_ref(query, positive_key)

    # Default path: bf16 MXU operands, auto tile selection (nq=2 for megacore).
    loss = info_nce_pallas(query, positive_key)
    jax.block_until_ready(loss)
    assert jnp.isfinite(loss)
    assert jnp.allclose(loss, ref, atol=5e-2, rtol=5e-2), (loss, ref)

    # f32 MXU operands (opt-in): tight tolerance.
    loss_f32 = info_nce_pallas(query, positive_key, matmul_dtype=jnp.float32)
    jax.block_until_ready(loss_f32)
    assert jnp.allclose(loss_f32, ref, atol=1e-4, rtol=1e-4), (loss_f32, ref)

    # Multi-tile grid exercising the key-axis accumulation (4 x 2 grid).
    N2, D2 = 256, 64
    kq2, kp2 = jax.random.split(jax.random.PRNGKey(1))
    q2 = jax.random.normal(kq2, (N2, D2), dtype=jnp.float32)
    p2 = jax.random.normal(kp2, (N2, D2), dtype=jnp.float32)
    ref2 = _info_nce_ref(q2, p2)

    loss2_f32 = info_nce_pallas(q2, p2, matmul_dtype=jnp.float32,
                                block_q=64, block_k=128)
    jax.block_until_ready(loss2_f32)
    assert jnp.allclose(loss2_f32, ref2, atol=1e-4, rtol=1e-4), (loss2_f32, ref2)

    loss2 = info_nce_pallas(q2, p2)  # bf16 default, auto tiles
    jax.block_until_ready(loss2)
    assert jnp.allclose(loss2, ref2, atol=5e-2, rtol=5e-2), (loss2, ref2)

    print("KERNEL_OK")
</pallas_src>

<mosaic_0001>
module attributes {stable_mosaic.version = 11 : i64} {
  func.func @_infonce_kernel(%arg0: i32, %arg1: i32, %arg2: memref<16x128xbf16, #tpu.memory_space<vmem>>, %arg3: memref<128x32xbf16, #tpu.memory_space<vmem>>, %arg4: memref<16x1xf32, #tpu.memory_space<vmem>>, %arg5: memref<16x1xf32, #tpu.memory_space<vmem>>, %arg6: memref<16x1xf32, #tpu.memory_space<vmem>>) attributes {dimension_semantics = [#tpu.dimension_semantics<parallel>, #tpu.dimension_semantics<arbitrary>], iteration_bounds = array<i64: 2, 1>, scalar_prefetch = 0 : i64, scratch_operands = 1 : i64, tpu.core_type = #tpu.core_type<tc>, window_params = [{transform_indices = @transform_0, window_bounds = array<i64: 16, 128>}, {transform_indices = @transform_1, window_bounds = array<i64: 128, 32>}, {transform_indices = @transform_2, window_bounds = array<i64: 16, 1>}, {transform_indices = @transform_3, window_bounds = array<i64: 16, 1>}]} {
    %c0_i32 = arith.constant 0 : i32
    %0 = arith.cmpi eq, %arg1, %c0_i32 : i32
    %1 = arith.extui %0 : i1 to i32
    %c0_i32_0 = arith.constant 0 : i32
    %2 = arith.cmpi ne, %1, %c0_i32_0 : i32
    scf.if %2 {
      %cst_12 = arith.constant 0.000000e+00 : f32
      %17 = vector.broadcast %cst_12 : f32 to vector<16x1xf32>
      %c0_13 = arith.constant 0 : index
      %c0_14 = arith.constant 0 : index
      %18 = vector.load %arg6[%c0_13, %c0_14] : memref<16x1xf32, #tpu.memory_space<vmem>>, vector<16x1xf32>
      tpu.vector_store %arg6[%c0_13, %c0_14], %17 {strides = array<i32>} : memref<16x1xf32, #tpu.memory_space<vmem>>, vector<16x1xf32>,
    } else {
    }
    %c0 = arith.constant 0 : index
    %c0_1 = arith.constant 0 : index
    %3 = vector.load %arg2[%c0, %c0_1] : memref<16x128xbf16, #tpu.memory_space<vmem>>, vector<16x128xbf16>
    %c0_2 = arith.constant 0 : index
    %c0_3 = arith.constant 0 : index
    %4 = vector.load %arg3[%c0_2, %c0_3] : memref<128x32xbf16, #tpu.memory_space<vmem>>, vector<128x32xbf16>
    %cst = arith.constant dense<0.000000e+00> : vector<16x32xf32>
    %5 = tpu.matmul %3, %4, %cst {dimension_numbers = #tpu.dot_dimension_numbers<[1], [0], [0], [1], [0, 0, 1, 1], [], []>} : vector<16x128xbf16>, vector<128x32xbf16>, vector<16x32xf32> -> vector<16x32xf32>
    %c0_4 = arith.constant 0 : index
    %c0_5 = arith.constant 0 : index
    %6 = vector.load %arg6[%c0_4, %c0_5] : memref<16x1xf32, #tpu.memory_space<vmem>>, vector<16x1xf32>
    %cst_6 = arith.constant 1.000000e+01 : f32
    %7 = vector.broadcast %cst_6 : f32 to vector<16x32xf32>
    %8 = arith.subf %5, %7 : vector<16x32xf32>
    %9 = math.exp %8 : vector<16x32xf32>
    %cst_7 = arith.constant dense<0.000000e+00> : vector<16xf32>
    %10 = vector.multi_reduction <add>, %9, %cst_7 [1] : vector<16x32xf32> to vector<16xf32>
    %11 = vector.shape_cast %10 : vector<16xf32> to vector<16x1xf32>
    %12 = arith.addf %6, %11 : vector<16x1xf32>
    %c0_8 = arith.constant 0 : index
    %c0_9 = arith.constant 0 : index
    %13 = vector.load %arg6[%c0_8, %c0_9] : memref<16x1xf32, #tpu.memory_space<vmem>>, vector<16x1xf32>
    tpu.vector_store %arg6[%c0_8, %c0_9], %12 {strides = array<i32>} : memref<16x1xf32, #tpu.memory_space<vmem>>, vector<16x1xf32>,
    %c0_i32_10 = arith.constant 0 : i32
    %14 = arith.cmpi eq, %arg1, %c0_i32_10 : i32
    %15 = arith.extui %14 : i1 to i32
    %c0_i32_11 = arith.constant 0 : i32
    %16 = arith.cmpi ne, %15, %c0_i32_11 : i32
    scf.if %16 {
      %c0_12 = arith.constant 0 : index
      %c0_13 = arith.constant 0 : index
      %17 = vector.load %arg6[%c0_12, %c0_13] : memref<16x1xf32, #tpu.memory_space<vmem>>, vector<16x1xf32>
      %18 = math.log %17 : vector<16x1xf32>
      %cst_14 = arith.constant 1.000000e+01 : f32
      %19 = vector.broadcast %cst_14 : f32 to vector<16x1xf32>
      %20 = arith.addf %19, %18 : vector<16x1xf32>
      %c0_15 = arith.constant 0 : index
      %c0_16 = arith.constant 0 : index
      %21 = vector.load %arg4[%c0_15, %c0_16] : memref<16x1xf32, #tpu.memory_space<vmem>>, vector<16x1xf32>
      %22 = arith.subf %20, %21 : vector<16x1xf32>
      %c0_17 = arith.constant 0 : index
      %c0_18 = arith.constant 0 : index
      %23 = vector.load %arg5[%c0_17, %c0_18] : memref<16x1xf32, #tpu.memory_space<vmem>>, vector<16x1xf32>
      tpu.vector_store %arg5[%c0_17, %c0_18], %22 {strides = array<i32>} : memref<16x1xf32, #tpu.memory_space<vmem>>, vector<16x1xf32>,
    } else {
    }
    return
  }
  func.func @transform_0(%arg0: i32, %arg1: i32) -> (i32, i32) {
    %c0_i32 = arith.constant 0 : i32
    %c0_i32_0 = arith.constant 0 : i32
    return %arg0, %c0_i32 : i32, i32
  }
  func.func @transform_1(%arg0: i32, %arg1: i32) -> (i32, i32) {
    %c0_i32 = arith.constant 0 : i32
    %c0_i32_0 = arith.constant 0 : i32
    return %c0_i32, %arg1 : i32, i32
  }
  func.func @transform_2(%arg0: i32, %arg1: i32) -> (i32, i32) {
    %c0_i32 = arith.constant 0 : i32
    %c0_i32_0 = arith.constant 0 : i32
    return %arg0, %c0_i32 : i32, i32
  }
  func.func @transform_3(%arg0: i32, %arg1: i32) -> (i32, i32) {
    %c0_i32 = arith.constant 0 : i32
    %c0_i32_0 = arith.constant 0 : i32
    return %arg0, %c0_i32 : i32, i32
  }
}

</mosaic_0001>

<bundles_post_ra>
// kernel: tpu_custom_call.1
= control target key start
LH: loop header
LB: loop body
LE: loop exit
PB: predicated region body
PF: predicated region fallthrough
CT: control target
= control target key end

     0   :  { %s618_s12 = smov 0   ;;  %s620_s13 = smov 0   ;;  %s688_s0 = inlined_call_operand.vmem [shape: bf16[32,128], index: 0, kind: input, shape index: {}]   ;;  %s689_s1 = inlined_call_operand.vmem [shape: bf16[128,32], index: 1, kind: input, shape index: {}]   ;;  %s690_s2 = inlined_call_operand.vmem [shape: f32[32,1], index: 2, kind: input, shape index: {}]   ;;  %s691_s3 = inlined_call_operand.vmem [shape: f32[32,1], index: 3, kind: output, shape index: {}]  }
   0x1   :  { %s622_s14 = smov 0  }
   0x2 LB: > { %s25_s15 = sadd.s32 1, %s590_s13  ;;  %p480_p0 = scmp.ge.s32.totalorder %s594_s14, 1  ;;  %s594_s14 = sphi %s622_s14, %s13_s14   ;;  %s590_s13 = sphi %s620_s13, %s693_s13   ;;  %s586_s12 = sphi %s618_s12, %s692_s12  }
   0x3   : > { %p27_p1 = scmp.ge.s32.totalorder %s25_s15, 2  ;;  %p170_p2 = scmp.lt.s32.totalorder %s594_s14, 3 }
   0x5   : > { %s695_s15 = smov (%p27_p1, %s25_s15), 0  ;;  %p171_p3 = pnand %p480_p0, %p170_p2 }
   0x6   : > { %s481_s20 = sshll.u32 (!%p171_p3), %s586_s12, 1 }
   0x7   : > { %174 = sbr.rel (%p171_p3) target bundleno = 430 (0x1ae), region = 32  ;;  %p204_p4 = scmp.lt.s32.totalorder (!%p171_p3), %s481_s20, 3 }
   0xc   : > { %v555_v0 = vld [vmem:[%s689_s1 + $0x38] sm:$0xff]   ;;  %v596_v1 = vmov 0.0   ;;  %v556_v2 = vld [vmem:[%s689_s1 + $0x30] sm:$0xff]   ;;  %vm597_vm0 = vmmov 0   ;;  %s697_s20 = smov (!%p204_p4, %s481_s20), 3  ;;  %v557_v3 = vld [vmem:[%s689_s1 + $0x28] sm:$0xff]  }
   0xd   : > { %509 = vmatprep.subr.bf16.mxu0 %v596_v1  ;;  %525 = vmatprep.mubr.msk.bf16.mxu0 %vm597_vm0, %v596_v1  ;;  %s482_s23 = sshll.u32 %s697_s20, 2  ;;  %v558_v4 = vld [vmem:[%s689_s1 + $0x20] sm:$0xff]   ;;  %v559_v5 = vld [vmem:[%s689_s1 + $0x18] sm:$0xff]   ;;  %v560_v6 = vld [vmem:[%s689_s1 + $0x10] sm:$0xff]   ;;  %vm230_vm1 = vcmask 7168   ;;  %vm354_vm2 = vcmask 261120  }
   0xe   : > { %510 = vmatpush3.bf16.msra.mxu0 %v555_v0  ;;  %s207_s26 = scalar_lea.vmem %s688_s0, %s482_s23  ;;  %v561_v7 = vld [vmem:[%s689_s1 + $0x8] sm:$0xff]   ;;  %v562_v8 = vld [vmem:[%s689_s1] sm:$0xff]   ;;  %231 = vst.msk [vmem:[#allocation2] sm:$0xff] %vm230_vm1, %v596_v1  ;;  %232 = vst.msk [vmem:[#allocation2 + $0x8] sm:$0xff] %vm230_vm1, %v596_v1  ;;  %s484_s10 = sshll.u32 %s697_s20, 3 }
   0xf   : > { %511 = vmatprep.subr.bf16.mxu0 %v596_v1  ;;  %v563_v9 = vld [vmem:[%s207_s26] sm:$0xff]   ;;  %s217_s16 = scalar_lea.vmem %s690_s2, %s484_s10  ;;  %s223_s19 = scalar_lea.vmem %s691_s3, %s484_s10 }
  0x10   : > { %v377_v32 = vld [vmem:[%s217_s16] sm:$0xff]  ;;  %v378_v37 = vld [vmem:[%s217_s16 + $0x8] sm:$0xff] }
  0x12   : > { %512 = vmatpush3.bf16.msra.mxu0 %v556_v2 }
  0x13   : > { %513 = vmatprep.subr.bf16.mxu0 %v596_v1 }
  0x15   : > { %v346_v22 = vld [vmem:[#allocation2] sm:$0xff]  ;;  %v347_v25 = vld [vmem:[#allocation2 + $0x8] sm:$0xff] }
  0x16   : > { %514 = vmatpush3.bf16.msra.mxu0 %v557_v3 }
  0x17   : > { %515 = vmatprep.subr.bf16.mxu0 %v596_v1 }
  0x1a   : > { %516 = vmatpush3.bf16.msra.mxu0 %v558_v4 }
  0x1b   : > { %517 = vmatprep.subr.bf16.mxu0 %v596_v1 }
  0x1e   : > { %518 = vmatpush3.bf16.msra.mxu0 %v559_v5 }
  0x1f   : > { %519 = vmatprep.subr.bf16.mxu0 %v596_v1 }
  0x22   : > { %520 = vmatpush3.bf16.msra.mxu0 %v560_v6 }
  0x23   : > { %521 = vmatprep.subr.bf16.mxu0 %v596_v1 }
  0x26   : > { %522 = vmatpush3.bf16.msra.mxu0 %v561_v7 }
  0x27   : > { %523 = vmatprep.subr.bf16.mxu0 %v596_v1 }
  0x2a   : > { %524 = vmatpush3.bf16.msra.mxu0 %v562_v8 }
  0x2d   : > { %526 = vmatmul.mubr.bf16.vlgmr.msra.gmra.mxu0 %v563_v9 }
  0xed   : > { %v339_v10 = vpop.f32.mrf.mxu0 }
  0xee   : > { %v496_v11 = vadd.f32 -10.0, %v339_v10 }
  0xef   : > { %v527_v12 = vpop.f32.mrf.mxu0 }
  0xf0   : > { %v350_v13 = vmul.f32 1.442695, %v496_v11 }
  0xf1   : > { %v342_v14 = vpop.f32.mrf.mxu0 }
  0xf2   : > { %564 = vpow2.f32 %v350_v13  ;;  %v497_v15 = vadd.f32 -10.0, %v342_v14 }
  0xf3   : > { %v528_v16 = vpop.f32.mrf.mxu0 }
  0xf4   : > { %v352_v17 = vmul.f32 1.442695, %v497_v15 }
  0xf6   : > { %566 = vpow2.f32 %v352_v17 }
  0xff   : > { %v565_v18 = vpop.eup %564 }
 0x100   : > { %v355_v19 = vsel %vm354_vm2, %v565_v18, 0.0 }
 0x101   : > { %356 = vadd.xlane.f32.xlu0 %v355_v19 }
 0x103   : > { %v567_v20 = vpop.eup %566 }
 0x104   : > { %v358_v21 = vsel %vm354_vm2, %v567_v20, 0.0 }
 0x105   : > { %359 = vadd.xlane.f32.xlu0 %v358_v21 }
 0x18a   : > { %v357_v23 = vpop.xlane.xlu0 %356 }
 0x18b   : > { %v361_v24 = vadd.f32 %v357_v23, %v346_v22 }
 0x18d   : > { %364 = vst.msk [vmem:[#allocation2] sm:$0xff] %vm230_vm1, %v361_v24 }
 0x18e   : > { %v360_v26 = vpop.xlane.xlu0 %359 }
 0x18f   : > { %v362_v27 = vadd.f32 %v360_v26, %v347_v25 }
 0x191   : > { %365 = vst.msk [vmem:[#allocation2 + $0x8] sm:$0xff] %vm230_vm1, %v362_v27 }
 0x194   : > { %v369_v28 = vld [vmem:[#allocation2] sm:$0xff] }
 0x195   : > { %568 = vlog2.f32 %v369_v28 }
 0x198   : > { %v370_v29 = vld [vmem:[#allocation2 + $0x8] sm:$0xff] }
 0x199   : > { %570 = vlog2.f32 %v370_v29 }
 0x1a2   : > { %v569_v30 = vpop.eup %568 }
 0x1a3   : > { %v372_v31 = vmul.f32 0.6931472, %v569_v30 }
 0x1a5   : > { %v375_v33 = vadd.f32 10.0, %v372_v31 }
 0x1a6   : > { %v571_v34 = vpop.eup %570 }
 0x1a7   : > { %v379_v35 = vsub.f32 %v375_v33, %v377_v32  ;;  %v374_v36 = vmul.f32 0.6931472, %v571_v34 }
 0x1a9   : > { %381 = vst.msk [vmem:[%s223_s19] sm:$0xff] %vm230_vm1, %v379_v35  ;;  %v376_v38 = vadd.f32 10.0, %v374_v36 }
 0x1ab   : > { %v380_v39 = vsub.f32 %v376_v38, %v378_v37 }
 0x1ad   : > { %382 = vst.msk [vmem:[%s223_s19 + $0x8] sm:$0xff] %vm230_vm1, %v380_v39 }
 0x1ae PF: > { %s13_s14 = sadd.s32 1, %s594_s14   ;;  %s692_s12 = smov %s590_s13 }
 0x1af   : > { %p10_p5 = scmp.ge.s32.totalorder %s13_s14, 4   ;;  %s693_s13 = smov %s695_s15 }
 0x1b1   :  { %12 = sbr.rel (!%p10_p5) target bundleno = 2 (0x2), region = 76 }

</bundles_post_ra>
